<compile_context>
chip_gen: v6e
topology: v6e:2x2x1
jax: 0.10.0
libtpu: 0.0.40
codegen_flags: <defaults>
</compile_context>

<pallas_src>
import functools

import jax
import jax.numpy as jnp
from jax.experimental import pallas as pl
from jax.experimental.pallas import tpu as pltpu


VMEM_BUDGET_BYTES = 8 << 20   # per-tile working-set budget (well under every chip's scoped VMEM)


def _round_up(x, m):
    return (x + m - 1) // m * m


def fm_kernel(xT_ref, idxT_ref, rhsT_ref, out_ref, *, fn_pad, cards_pad, d_pad):
    # xT_ref   : (Fn, tb)        numerical features, batch on lanes
    # idxT_ref : (Fc, tb) int32  LOCAL categorical indices (0..card_j-1), batch on lanes
    # rhsT_ref : (M_pad, K_pad)  fused weight matrix (VMEM-resident, constant index_map)
    #            rows [0:d_pad)            -> coefficients producing S  = sum_f v
    #            rows [d_pad:2*d_pad)      -> coefficients producing Q  = sum_f v^2
    #            row  2*d_pad              -> coefficients producing the linear term
    # out_ref  : (1, tb)         logits, batch on lanes (lane-dense store)
    xT = xT_ref[...]
    idxT = idxT_ref[...]
    fn, tb = xT.shape

    # ---- build lhsT from 8-sublane-aligned segments (no relayout copies) ----
    segs = [xT]
    if fn_pad > fn:
        zrows = jnp.zeros((fn_pad - fn, tb), jnp.float32)
        segs += [zrows, xT * xT, zrows]
    else:
        segs += [xT * xT]
    # per-feature one-hot over that feature's padded vocab slice only (cards_pad static)
    for j, cp in enumerate(cards_pad):
        rows = jax.lax.broadcasted_iota(jnp.int32, (cp, tb), 0)
        segs.append((rows == idxT[j:j + 1, :]).astype(jnp.float32))
    # constant-1 row block (carries sum_f bE, sum_f bE^2 and the global bias)
    one_rows = jax.lax.broadcasted_iota(jnp.int32, (8, tb), 0)
    segs.append((one_rows == 0).astype(jnp.float32))
    lhsT = jnp.concatenate(segs, axis=0)                     # (K_pad, tb), 8-aligned joins

    # ---- single MXU matmul produces S, Q and the linear term at once ----
    res = jnp.dot(rhsT_ref[...], lhsT, preferred_element_type=jnp.float32)   # (M_pad, tb)

    S = res[0:d_pad, :]                      # sum over features of embeddings   (padded rows = 0)
    Q = res[d_pad:2 * d_pad, :]              # sum over features of embeddings^2 (padded rows = 0)
    lin = res[2 * d_pad:2 * d_pad + 1, :]    # first-order (linear) term
    out_ref[...] = lin + 0.5 * jnp.sum(S * S - Q, axis=0, keepdims=True)


def _build_rhsT(params, cards, fn_pad, cards_pad, d_pad):
    """Fold ALL weights into one (M_pad, K_pad) matrix (tiny one-time algebra).

    num_emb[b,f,:] = x[b,f]*W[f] + bE[f]
      sum_f num_emb   = x @ W               + sum_f bE
      sum_f num_emb^2 = x^2 @ W^2 + x @ (2*W*bE) + sum_f bE^2
    cat contributions = onehot_j @ [emb | emb^2 | fc]   (per feature, padded slices)
    linear            = x @ nlw + onehot @ fc + (num_lin_b + cat_lin_b)
    """
    f32 = jnp.float32
    W = params["num_emb_w"].astype(f32)            # (Fn, D)
    bE = params["num_emb_b"].astype(f32)           # (Fn, D)
    nlw = params["num_lin_w"].astype(f32)          # (Fn, 1)
    emb = params["cat_emb_table"].astype(f32)      # (C, D)
    fc = params["cat_fc_table"].astype(f32)        # (C, 1)
    bias = (params["num_lin_b"].reshape(()) +
            params["cat_lin_b"].reshape(())).astype(f32)
    Fn, D = W.shape
    m_pad = 2 * d_pad + 8

    def rows(s, q, lin):
        # (R, D), (R, D), (R, 1) -> (R, M_pad) with S/Q/lin blocks at 8-aligned columns
        R = s.shape[0]
        zd = jnp.zeros((R, d_pad - D), f32)
        zl = jnp.zeros((R, m_pad - 2 * d_pad - 1), f32)
        return jnp.concatenate([s, zd, q, zd, lin, zl], axis=1)

    def pad_rows(a, rpad):
        return jnp.pad(a, ((0, rpad - a.shape[0]), (0, 0)))

    blocks = [
        pad_rows(rows(W, 2.0 * W * bE, nlw), fn_pad),                               # from x
        pad_rows(rows(jnp.zeros_like(W), W * W, jnp.zeros((Fn, 1), f32)), fn_pad),  # from x^2
    ]
    off = 0
    for c, cp in zip(cards, cards_pad):                                             # from multi-hot
        e, f = emb[off:off + c], fc[off:off + c]
        blocks.append(pad_rows(rows(e, e * e, f), cp))
        off += c
    one_row = rows(jnp.sum(bE, axis=0, keepdims=True),
                   jnp.sum(bE * bE, axis=0, keepdims=True),
                   bias.reshape(1, 1))
    blocks.append(pad_rows(one_row, 8))                                             # from const 1
    rhs = jnp.concatenate(blocks, axis=0)            # (K_pad, M_pad)
    return rhs.T                                     # (M_pad, K_pad)


def fm_forward(x_num, x_cat, params, categories, *, tb=None):
    B, Fn = x_num.shape
    Fc = x_cat.shape[1]
    D = params["num_emb_w"].shape[1]
    cards = [int(c) for c in categories]
    cards_pad = [_round_up(c, 8) for c in cards]
    fn_pad = _round_up(Fn, 8)
    d_pad = _round_up(D, 8)
    c_pad = sum(cards_pad)
    k_pad = 2 * fn_pad + c_pad + 8
    m_pad = 2 * d_pad + 8

    rhsT = _build_rhsT(params, cards, fn_pad, cards_pad, d_pad)        # (M_pad, K_pad)

    # ---- batch tile selection: VMEM-budgeted, and >=2 parallel tiles for v7x megacore ----
    if tb is None:
        # per-lane f32 words: double-buffered xT/idxT/out + lhsT + one-hot segs + matmul result
        per_lane_bytes = 4 * (2 * (Fn + Fc + 1) + 3 * k_pad + m_pad)
        tb_vmem = max(128, min(4096, (VMEM_BUDGET_BYTES // per_lane_bytes) // 128 * 128))
        bp128 = _round_up(B, 128)
        if bp128 <= 2 * tb_vmem:
            # whole batch fits in <=2 tiles: split so both v7x TensorCores get work
            # (costs one extra ~0.35us grid step on single-TC v5e/v6e — negligible)
            tb = max(128, _round_up(-(-bp128 // 2), 128))
        else:
            tb = tb_vmem
    tb = max(128, _round_up(tb, 128))
    Bp = _round_up(B, tb)

    # Layout plumbing: batch on lanes.  allow_input_fusion lets XLA fuse this pad/transpose
    # into the pallas_call operands rather than an extra HBM pass.
    xT = jnp.pad(x_num.astype(jnp.float32), ((0, Bp - B), (0, 0))).T   # (Fn, Bp)
    idxT = jnp.pad(x_cat.astype(jnp.int32), ((0, Bp - B), (0, 0))).T   # (Fc, Bp) local indices

    kernel = functools.partial(fm_kernel, fn_pad=fn_pad,
                               cards_pad=tuple(cards_pad), d_pad=d_pad)
    out = pl.pallas_call(
        kernel,
        out_shape=jax.ShapeDtypeStruct((1, Bp), jnp.float32),
        grid_spec=pltpu.PrefetchScalarGridSpec(
            num_scalar_prefetch=0,
            grid=(Bp // tb,),
            in_specs=[
                pl.BlockSpec((Fn, tb), lambda i: (0, i)),        # xT   (batch on lanes)
                pl.BlockSpec((Fc, tb), lambda i: (0, i)),        # idxT (batch on lanes)
                pl.BlockSpec((m_pad, k_pad), lambda i: (0, 0)),  # fused RHS, VMEM-resident
            ],
            out_specs=pl.BlockSpec((1, tb), lambda i: (0, i)),   # lane-dense output
        ),
        compiler_params=pltpu.CompilerParams(
            dimension_semantics=("parallel",),
            vmem_limit_bytes=32 * 1024 * 1024,
            allow_input_fusion=[True, True, True],
        ),
    )(xT, idxT, rhsT)
    return out[0, :B]   # FM.forward squeezes the last dim when n_classes == 1


def fm_reference(x_num, x_cat, params):
    """Pure-JAX reference mirroring the PyTorch FM forward (n_classes=1)."""
    offsets = params["offsets"]
    idx = x_cat + offsets[None, :]
    lin = (x_num @ params["num_lin_w"] + params["num_lin_b"]
           + jnp.sum(params["cat_fc_table"][idx, 0], axis=1, keepdims=True)
           + params["cat_lin_b"])
    num_emb = x_num[:, :, None] * params["num_emb_w"][None] + params["num_emb_b"][None]
    cat_emb = params["cat_emb_table"][idx]
    emb = jnp.concatenate([num_emb, cat_emb], axis=1)
    sq_of_sum = jnp.sum(emb, axis=1) ** 2
    sum_of_sq = jnp.sum(emb ** 2, axis=1)
    fm = 0.5 * jnp.sum(sq_of_sum - sum_of_sq, axis=1, keepdims=True)
    return (lin + fm)[:, 0]


if __name__ == "__main__":
    key = jax.random.PRNGKey(0)
    B, Fn, D = 1000, 4, 8              # non-multiple-of-tile batch -> exercises padding + 2-tile grid
    categories = [5, 4, 6]             # cardinalities of categorical features
    Fc = len(categories)
    total_cat = sum(categories)

    ks = jax.random.split(key, 10)
    params = {
        "num_lin_w": jax.random.normal(ks[0], (Fn, 1), jnp.float32) * 0.1,
        "num_lin_b": jnp.zeros((1, 1), jnp.float32),
        "cat_fc_table": jax.random.normal(ks[1], (total_cat, 1), jnp.float32) * 0.1,
        "cat_lin_b": jnp.zeros((1, 1), jnp.float32),
        # NumEmbedding(n=Fn, d_in=1, d_out=D, bias=True): weight (Fn,1,D) -> (Fn,D)
        "num_emb_w": jax.random.normal(ks[2], (Fn, D), jnp.float32) * 0.1,
        "num_emb_b": jax.random.normal(ks[3], (Fn, D), jnp.float32) * 0.1,
        # CatEmbedding: xavier-uniform-ish embedding table
        "cat_emb_table": jax.random.uniform(ks[4], (total_cat, D), jnp.float32,
                                            minval=-0.3, maxval=0.3),
        "offsets": jnp.cumsum(jnp.array([0] + categories[:-1], jnp.int32)),  # for the reference
    }

    x_num = jax.random.normal(ks[5], (B, Fn), jnp.float32)
    x_cat = jnp.stack(
        [jax.random.randint(ks[6 + j], (B,), 0, categories[j], jnp.int32)
         for j in range(Fc)], axis=1)

    out = fm_forward(x_num, x_cat, params, categories)   # auto tile: 2 parallel 512-lane tiles
    jax.block_until_ready(out)

    ref = fm_reference(x_num, x_cat, params)
    assert out.shape == (B,)
    assert jnp.allclose(out, ref, atol=1e-4, rtol=1e-4), (out[:8], ref[:8])
    print("KERNEL_OK")
</pallas_src>

<mosaic_0001>
module attributes {stable_mosaic.version = 11 : i64} {
  func.func @fm_kernel(%arg0: i32, %arg1: memref<4x512xf32, #tpu.memory_space<vmem>>, %arg2: memref<3x512xi32, #tpu.memory_space<vmem>>, %arg3: memref<24x48xf32, #tpu.memory_space<vmem>>, %arg4: memref<1x512xf32, #tpu.memory_space<vmem>>) attributes {dimension_semantics = [#tpu.dimension_semantics<parallel>], iteration_bounds = array<i64: 2>, scalar_prefetch = 0 : i64, scratch_operands = 0 : i64, tpu.core_type = #tpu.core_type<tc>, window_params = [{transform_indices = @transform_0, window_bounds = array<i64: 4, 512>}, {transform_indices = @transform_1, window_bounds = array<i64: 3, 512>}, {pipeline_mode = #tpu.pipeline_mode<synchronous>, transform_indices = @transform_2, window_bounds = array<i64: 24, 48>}, {transform_indices = @transform_3, window_bounds = array<i64: 1, 512>}]} {
    %c0 = arith.constant 0 : index
    %c0_0 = arith.constant 0 : index
    %0 = vector.load %arg1[%c0, %c0_0] : memref<4x512xf32, #tpu.memory_space<vmem>>, vector<4x512xf32>
    %c0_1 = arith.constant 0 : index
    %c0_2 = arith.constant 0 : index
    %1 = vector.load %arg2[%c0_1, %c0_2] : memref<3x512xi32, #tpu.memory_space<vmem>>, vector<3x512xi32>
    %cst = arith.constant 0.000000e+00 : f32
    %2 = vector.broadcast %cst : f32 to vector<4x512xf32>
    %3 = arith.mulf %0, %0 : vector<4x512xf32>
    %4 = tpu.iota {dimensions = array<i32: 0>} : vector<8x512xi32>
    %5 = vector.extract_strided_slice %1 {offsets = [0, 0], sizes = [1, 512], strides = [1, 1]} : vector<3x512xi32> to vector<1x512xi32>
    %6 = vector.broadcast %5 : vector<1x512xi32> to vector<8x512xi32>
    %7 = arith.cmpi eq, %4, %6 : vector<8x512xi32>
    %8 = arith.extui %7 : vector<8x512xi1> to vector<8x512xi32>
    %9 = arith.sitofp %8 : vector<8x512xi32> to vector<8x512xf32>
    %10 = tpu.iota {dimensions = array<i32: 0>} : vector<8x512xi32>
    %11 = vector.extract_strided_slice %1 {offsets = [1, 0], sizes = [1, 512], strides = [1, 1]} : vector<3x512xi32> to vector<1x512xi32>
    %12 = vector.broadcast %11 : vector<1x512xi32> to vector<8x512xi32>
    %13 = arith.cmpi eq, %10, %12 : vector<8x512xi32>
    %14 = arith.extui %13 : vector<8x512xi1> to vector<8x512xi32>
    %15 = arith.sitofp %14 : vector<8x512xi32> to vector<8x512xf32>
    %16 = tpu.iota {dimensions = array<i32: 0>} : vector<8x512xi32>
    %17 = vector.extract_strided_slice %1 {offsets = [2, 0], sizes = [1, 512], strides = [1, 1]} : vector<3x512xi32> to vector<1x512xi32>
    %18 = vector.broadcast %17 : vector<1x512xi32> to vector<8x512xi32>
    %19 = arith.cmpi eq, %16, %18 : vector<8x512xi32>
    %20 = arith.extui %19 : vector<8x512xi1> to vector<8x512xi32>
    %21 = arith.sitofp %20 : vector<8x512xi32> to vector<8x512xf32>
    %22 = tpu.iota {dimensions = array<i32: 0>} : vector<8x512xi32>
    %c0_i32 = arith.constant 0 : i32
    %23 = vector.broadcast %c0_i32 : i32 to vector<8x512xi32>
    %24 = arith.cmpi eq, %22, %23 : vector<8x512xi32>
    %25 = arith.extui %24 : vector<8x512xi1> to vector<8x512xi32>
    %26 = arith.sitofp %25 : vector<8x512xi32> to vector<8x512xf32>
    %27 = tpu.concatenate %0, %2, %3, %2, %9, %15, %21, %26 in 0 : vector<4x512xf32>, vector<4x512xf32>, vector<4x512xf32>, vector<4x512xf32>, vector<8x512xf32>, vector<8x512xf32>, vector<8x512xf32>, vector<8x512xf32> -> vector<48x512xf32>
    %c0_3 = arith.constant 0 : index
    %c0_4 = arith.constant 0 : index
    %28 = vector.load %arg3[%c0_3, %c0_4] : memref<24x48xf32, #tpu.memory_space<vmem>>, vector<24x48xf32>
    %cst_5 = arith.constant dense<0.000000e+00> : vector<24x512xf32>
    %29 = tpu.matmul %28, %27, %cst_5 {dimension_numbers = #tpu.dot_dimension_numbers<[1], [0], [0], [1], [0, 0, 1, 1], [], []>} : vector<24x48xf32>, vector<48x512xf32>, vector<24x512xf32> -> vector<24x512xf32>
    %30 = vector.extract_strided_slice %29 {offsets = [0, 0], sizes = [8, 512], strides = [1, 1]} : vector<24x512xf32> to vector<8x512xf32>
    %31 = vector.extract_strided_slice %29 {offsets = [8, 0], sizes = [8, 512], strides = [1, 1]} : vector<24x512xf32> to vector<8x512xf32>
    %32 = vector.extract_strided_slice %29 {offsets = [16, 0], sizes = [1, 512], strides = [1, 1]} : vector<24x512xf32> to vector<1x512xf32>
    %33 = arith.mulf %30, %30 : vector<8x512xf32>
    %34 = arith.subf %33, %31 : vector<8x512xf32>
    %cst_6 = arith.constant dense<0.000000e+00> : vector<512xf32>
    %35 = vector.multi_reduction <add>, %34, %cst_6 [0] : vector<8x512xf32> to vector<512xf32>
    %36 = vector.shape_cast %35 : vector<512xf32> to vector<1x512xf32>
    %cst_7 = arith.constant 5.000000e-01 : f32
    %37 = vector.broadcast %cst_7 : f32 to vector<1x512xf32>
    %38 = arith.mulf %37, %36 : vector<1x512xf32>
    %39 = arith.addf %32, %38 : vector<1x512xf32>
    %c0_8 = arith.constant 0 : index
    %c0_9 = arith.constant 0 : index
    %40 = vector.load %arg4[%c0_8, %c0_9] : memref<1x512xf32, #tpu.memory_space<vmem>>, vector<1x512xf32>
    tpu.vector_store %arg4[%c0_8, %c0_9], %39 {strides = array<i32>} : memref<1x512xf32, #tpu.memory_space<vmem>>, vector<1x512xf32>,
    return
  }
  func.func @transform_0(%arg0: i32) -> (i32, i32) {
    %c0_i32 = arith.constant 0 : i32
    %c0_i32_0 = arith.constant 0 : i32
    return %c0_i32, %arg0 : i32, i32
  }
  func.func @transform_1(%arg0: i32) -> (i32, i32) {
    %c0_i32 = arith.constant 0 : i32
    %c0_i32_0 = arith.constant 0 : i32
    return %c0_i32, %arg0 : i32, i32
  }
  func.func @transform_2(%arg0: i32) -> (i32, i32) {
    %c0_i32 = arith.constant 0 : i32
    %c0_i32_0 = arith.constant 0 : i32
    %c0_i32_1 = arith.constant 0 : i32
    return %c0_i32, %c0_i32_0 : i32, i32
  }
  func.func @transform_3(%arg0: i32) -> (i32, i32) {
    %c0_i32 = arith.constant 0 : i32
    %c0_i32_0 = arith.constant 0 : i32
    return %c0_i32, %arg0 : i32, i32
  }
}

</mosaic_0001>

<bundles_post_ra>
// kernel: tpu_custom_call.1
= control target key start
LH: loop header
LB: loop body
LE: loop exit
PB: predicated region body
PF: predicated region fallthrough
CT: control target
= control target key end

     0   :  { %8 = vsyncpa [#allocation3], 0  ;;  %s1354_s0 = inlined_call_operand.hbm [shape: f32[4,1024], index: 0, kind: input, shape index: {}]   ;;  %s1355_s1 = inlined_call_operand.hbm [shape: s32[3,1024], index: 1, kind: input, shape index: {}]   ;;  %s1356_s2 = inlined_call_operand.hbm [shape: f32[24,48], index: 2, kind: input, shape index: {}]   ;;  %s1357_s3 = inlined_call_operand.hbm [shape: f32[1,1024], index: 3, kind: output, shape index: {}]  }
   0x1   :  { %10 = vsyncpa [#allocation3 + $0x1], 0 }
   0x2   :  { %11 = vsyncpa [#allocation6], 0 }
   0x3   :  { %13 = vsyncpa [#allocation6 + $0x1], 0 }
   0x4   :  { %14 = vsyncpa [#allocation4], 0 }
   0x5   :  { %16 = vsyncpa [#allocation4 + $0x1], 0  ;;  %s1096_s12 = smov 0   ;;  %s1098_s13 = smov 0  }
   0x6   :  { %s1100_s14 = smov 0   ;;  %s1102_s15 = smov 0  }
   0x7 LB: > { %s1117_s16 = sadd.s32 4294967295, %s1065_s15   ;;  %s776_s17 = sadd.s32 4294967294, %s1065_s15   ;;  %s1065_s15 = sphi %s1102_s15, %s1379_s15   ;;  %s1061_s14 = sphi %s1100_s14, %s1378_s14   ;;  %s1057_s13 = sphi %s1098_s13, %s1377_s13   ;;  %s1053_s12 = sphi %s1096_s12, %s1376_s12  }
   0x8   : > { %p42_p0 = scmp.ne.s32.totalorder %s1057_s13, %s1053_s12  ;;  %p1358_p1 = scmp.eq.s32.totalorder %s1117_s16, 0 }
   0x9   : > { %p119_p3 = scmp.eq.s32.totalorder %s776_s17, 1  ;;  %p777_p5 = scmp.ge.s32.totalorder %s1065_s15, 1 }
   0xa   : > { %p1126_p4 = por %p1358_p1, %p42_p0  ;;  %p126_p7 = scmp.lt.s32.totalorder %s1065_s15, 3 }
   0xb   : > { %p1131_p6 = por %p119_p3, %p42_p0  ;;  %s1067_s21 = smov [#allocation7]  }
   0xc   : > { %s1362_s18 = scalar_select %p1126_p4, 1, 0 }
   0xd   : > { %s1363_s19 = scalar_select %p1131_p6, 1, 0 }
   0xe   : > { %p1136_p8 = pnand %p777_p5, %p126_p7  ;;  %s138_s22 = sshll.u32 %s1067_s21, 4  ;;  %s139_s22 = int_to_ptr.vmem [resolvable:$true] %s138_s22 }
   0xf   : > { %s1150_s24 = sadd.s32 1, %s1065_s15   ;;  %s29_s25 = sadd.s32 1, %s1061_s14 }
  0x10   : > { %s1364_s20 = scalar_select %p1136_p8, 1, 0 }
  0x11   : > { %p852_p9 = pneg %p1136_p8  ;;  %s26_s26 = ssub.s32 %s1065_s15, %s1150_s24 }
  0x12   : > { %s922_s27 = scalar_lea.vmem %s139_s22, 384  ;;  %p930_p5 = scmp.lt.s32.totalorder %s139_s22, %s139_s22 }
  0x13   : > { %p1145_p11 = pnand %p852_p9, %p1358_p1  ;;  %p923_p13 = scmp.ne.s32.totalorder %s139_s22, %s922_s27 }
  0x14   : > { %p931_p7 = scmp.lt.s32.totalorder %s922_s27, %s922_s27 }
  0x15   : > { %p913_p12 = pneg %p1145_p11 }
  0x16   : > { %p932_p10 = por %p931_p7, %p930_p5 }
  0x17   : > { %p925_p0 = pnand %p923_p13, %p913_p12 }
  0x19   : > { %p926_p3 = pneg %p925_p0 }
  0x1b   : > { %p933_p2 = pnand %p932_p10, %p926_p3 }
  0x1d   : > { %936 = shalt.err (!%p933_p2)
}
  0x1e   : > { %s1068_s28 = smov 128   ;;  %s1069_s29 = smov 8  }
  0x1f   : > { %855 = dma.hbm_to_vmem [thread:$0]  (!%p1145_p11), %s1356_s2, 384, %s139_s22, [#allocation6], %s1068_s28, %s1068_s28, %s1069_s29  }
  0x20   : > { %p27_p9 = scmp.eq.s32.totalorder %s26_s26, 0  ;;  %p36_p12 = scmp.ne.s32.totalorder %s1061_s14, %s1057_s13 }
  0x21   : > { %p37_p10 = scmp.eq.s32.totalorder %s1065_s15, 0  ;;  %p868_p2 = scmp.lt.s32.totalorder %s1065_s15, 2 }
  0x22   : > { %s1167_s5 = scalar_select %p27_p9, %s1061_s14, %s29_s25  }
  0x23   : > { %p38_p13 = por %p37_p10, %p36_p12  ;;  %p1366_p0 = scmp.eq.s32.totalorder %s1117_s16, 1 }
  0x24   : > { %s152_s7 = sand.u32 1, %s1061_s14   ;;  %s839_s8 = sshll.u32 %s1065_s15, 8 }
  0x25   : > { %p1171_p3 = por %p1366_p0, %p36_p12  ;;  %s1177_s9 = sshll.u32 %s152_s7, 4 }
  0x26   : > { %s1182_s17 = scalar_lea.hbm %s1354_s0, %s839_s8  ;;  %s156_s21 = scalar_lea.vmem [#allocation2], %s1177_s9 }
  0x27   : > { %s1367_s6 = scalar_select %p1171_p3, 1, 0 }
  0x28   : > { %s164_s22 = sshll.u32 %s156_s21, 4  ;;  %p1185_p11 = pnand %p868_p2, %p38_p13  ;;  %s165_s22 = int_to_ptr.vmem [resolvable:$true] %s164_s22 }
  0x29   : > { %s1192_s27 = scalar_lea.hbm %s1355_s1, %s839_s8  ;;  %s153_s28 = scalar_lea.sflag [#allocation3], %s152_s7 }
  0x2a   : > { %s937_s29 = scalar_lea.hbm %s1182_s17, 256  ;;  %p939_p7 = pneg %p1185_p11 }
  0x2b   : > { %p938_p5 = scmp.ne.s32.totalorder %s1182_s17, %s937_s29  ;;  %s942_s10 = scalar_lea.hbm %s1354_s0, 512 }
  0x2c   : > { %p943_p10 = scmp.lt.s32.totalorder %s1182_s17, %s1354_s0  ;;  %p944_p2 = scmp.lt.s32.totalorder %s942_s10, %s937_s29 }
  0x2d   : > { %p940_p9 = pnand %p939_p7, %p938_p5 }
  0x2e   : > { %p945_p13 = por %p944_p2, %p943_p10 }
  0x2f   : > { %p941_p12 = pneg %p940_p9 }
  0x31   : > { %p946_p0 = pnand %p945_p13, %p941_p12 }
  0x33   : > { %949 = shalt.err (!%p946_p0)
}
  0x34   : > { %s950_s7 = scalar_lea.vmem %s165_s22, 256  ;;  %s1070_s8 = smov [#allocation2]  }
  0x35   : > { %p951_p1 = scmp.ne.s32.totalorder %s165_s22, %s950_s7  ;;  %s955_s25 = sshll.u32 %s1070_s8, 4  ;;  %s956_s25 = int_to_ptr.vmem [resolvable:$false] %s955_s25 }
  0x36   : > { %s957_s26 = scalar_lea.vmem %s956_s25, 512  ;;  %p958_p9 = scmp.lt.s32.totalorder %s165_s22, %s956_s25 }
  0x37   : > { %p953_p6 = pnand %p951_p1, %p939_p7  ;;  %p959_p3 = scmp.lt.s32.totalorder %s957_s26, %s950_s7 }
  0x39   : > { %p954_p5 = pneg %p953_p6  ;;  %p960_p4 = por %p959_p3, %p958_p9 }
  0x3b   : > { %p961_p8 = pnand %p960_p4, %p954_p5 }
  0x3d   : > { %964 = shalt.err (!%p961_p8)
}
  0x3e   : > { %859 = dma.hbm_to_vmem [thread:$0]  (!%p1185_p11), %s1182_s17, 256, %s165_s22, %s153_s28  }
  0x3f   : > { %s171_s29 = sand.u32 1, %s1065_s15   ;;  %s175_s30 = scalar_lea.vmem [#allocation5], %s1177_s9 }
  0x40   : > { %s183_s4 = sshll.u32 %s175_s30, 4  ;;  %s172_s10 = scalar_lea.sflag [#allocation6], %s171_s29  ;;  %s184_s4 = int_to_ptr.vmem [resolvable:$true] %s183_s4 }
  0x41   : > { %s965_s11 = scalar_lea.hbm %s1192_s27, 256  ;;  %s970_s8 = scalar_lea.hbm %s1355_s1, 512 }
  0x42   : > { %p966_p1 = scmp.ne.s32.totalorder %s1192_s27, %s965_s11  ;;  %p971_p8 = scmp.lt.s32.totalorder %s1192_s27, %s1355_s1 }
  0x43   : > { %p972_p3 = scmp.lt.s32.totalorder %s970_s8, %s965_s11 }
  0x44   : > { %p968_p4 = pnand %p966_p1, %p939_p7 }
  0x45   : > { %p973_p12 = por %p972_p3, %p971_p8 }
  0x46   : > { %p969_p6 = pneg %p968_p4 }
  0x48   : > { %p974_p10 = pnand %p973_p12, %p969_p6 }
  0x4a   : > { %977 = shalt.err (!%p974_p10)
}
  0x4b   : > { %s978_s9 = scalar_lea.vmem %s184_s4, 256  ;;  %s1071_s17 = smov [#allocation5]  }
  0x4c   : > { %p979_p2 = scmp.ne.s32.totalorder %s184_s4, %s978_s9  ;;  %s983_s22 = sshll.u32 %s1071_s17, 4  ;;  %s984_s22 = int_to_ptr.vmem [resolvable:$false] %s983_s22 }
  0x4d   : > { %s985_s28 = scalar_lea.vmem %s984_s22, 512  ;;  %p986_p5 = scmp.lt.s32.totalorder %s184_s4, %s984_s22 }
  0x4e   : > { %p981_p13 = pnand %p979_p2, %p939_p7  ;;  %p987_p9 = scmp.lt.s32.totalorder %s985_s28, %s978_s9 }
  0x50   : > { %p982_p0 = pneg %p981_p13  ;;  %p988_p1 = por %p987_p9, %p986_p5 }
  0x52   : > { %p989_p4 = pnand %p988_p1, %p982_p0 }
  0x54   : > { %992 = shalt.err (!%p989_p4)
}
  0x55   : > { %862 = dma.hbm_to_vmem [thread:$0]  (!%p1185_p11), %s1192_s27, 256, %s184_s4, %s172_s10  }
  0x56   : > { %p1369_p6 = scmp.ne.s32.totalorder %s1364_s20, 0 }
  0x57   : > { %s1237_s29 = sand.u32 (!%p1369_p6), 1, %s1057_s13   ;;  %p1370_p7 = scmp.ne.s32.totalorder (!%p1369_p6), %s1362_s18, 0 }
  0x58   : > { %192 = sbr.rel (%p1369_p6) target bundleno = 362 (0x16a), region = 32  ;;  %s787_s30 = sshll.u32 (!%p1369_p6), %s1237_s29, 4 }
  0x59   : > { %s195_s11 = scalar_lea.sflag (!%p1369_p6), [#allocation3], %s1237_s29  ;;  %s1241_s21 = scalar_lea.vmem (!%p1369_p6), [#allocation2], %s787_s30 }
  0x5d   : > { %1036 = dma.done.wait (%p1370_p7), %s195_s11, 256  }
  0x5e   : > { %1038 = vsyncadd (%p1370_p7), %s195_s11, 4294967040  ;;  %s203_s23 = sand.u32 1, %s1117_s16   ;;  %s207_s27 = scalar_lea.vmem [#allocation5], %s787_s30 }
  0x5f   : > { %s204_s20 = scalar_lea.sflag [#allocation6], %s203_s23 }
  0x60   : > { %1040 = dma.done.wait (%p1370_p7), %s204_s20, 256  }
  0x61   : > { %1042 = vsyncadd (%p1370_p7), %s204_s20, 4294967040  ;;  %p1371_p11 = scmp.eq.s32.totalorder %s1117_s16, 0 }
  0x63   : > { %1044 = dma.done.wait (%p1371_p11), [#allocation6], 384   ;;  %p1372_p8 = pmov %p1371_p11 }
  0x64   : > { %v248_v0 = vlaneseq  ;;  %v1072_v1 = vmov 0.0   ;;  %v1073_v5 = vmov 1.0   ;;  %v244_v8 = vld [vmem:[%s207_s27] sm:$0x77]  ;;  %v245_v9 = vld [vmem:[%s207_s27 + $0x8] sm:$0x77] }
  0x65   : > { %1046 = vsyncadd (%p1372_p8), [#allocation6], 4294966912  ;;  %483 = vmatprep.mubr.f32.mxu0 %v1072_v1  ;;  %566 = vmatprep.mubr.f32.mxu1 %v1072_v1  ;;  %v242_v28 = vld [vmem:[%s1241_s21] sm:$0xff]  ;;  %v243_v29 = vld [vmem:[%s1241_s21 + $0x8] sm:$0xff]  ;;  %vm397_vm9 = vcmask 1043456   ;;  %vm409_vm14 = vcmask 392192  }
  0x66   : > { %v1259_v2 = vshrl.u32 %v248_v0, 7  ;;  %v246_v34 = vmul.f32 %v242_v28, %v242_v28  ;;  %v247_v37 = vmul.f32 %v243_v29, %v243_v29  ;;  %v387_v42 = vcombine.high %v242_v28, %v242_v28  ;;  %v406_v44 = vld [vmem:[#allocation7] sm:$0xff]  ;;  %v407_v45 = vld [vmem:[#allocation7 + $0x8] sm:$0xff]  ;;  %v408_v46 = vld [vmem:[#allocation7 + $0x10] sm:$0xff]  ;;  %s790_s18 = sshll.u32 %s1237_s29, 2  ;;  %s841_s4 = sshll.u32 %s1117_s16, 6 }
  0x67   : > { %v388_v43 = vcombine.high %v243_v29, %v243_v29  ;;  %s238_s10 = scalar_lea.vmem [#allocation8], %s790_s18  ;;  %vm656_vm15 = vcmp.lt.s32.totalorder %v248_v0, 512  ;;  %s672_s26 = scalar_lea.hbm %s1357_s3, %s841_s4 }
  0x68   : > { %vm382_vm0 = vcmp.eq.s32.totalorder %v1259_v2, 0  ;;  %v340_v3 = vsub.s32 2, %v1259_v2  ;;  %v344_v4 = vsub.s32 6, %v1259_v2  ;;  %v296_v6 = vsub.s32 1, %v1259_v2  ;;  %s674_s7 = sshll.u32 %s238_s10, 4  ;;  %s660_s9 = scalar_lea.sflag [#allocation4], %s1237_s29  ;;  %s675_s7 = int_to_ptr.vmem [resolvable:$true] %s674_s7 }
  0x69   : > { %804 = vmatprep.subr.msk.mxu0 %vm382_vm0, %v1073_v5  ;;  %819 = vmatprep.subr.msk.mxu1 %vm382_vm0, %v1073_v5  ;;  %v300_v7 = vsub.s32 5, %v1259_v2  ;;  %v252_v10 = vsub.s32 0, %v1259_v2  ;;  %v256_v11 = vsub.s32 4, %v1259_v2  ;;  %v393_v40 = vcombine.high %v246_v34, %v246_v34  ;;  %s993_s17 = scalar_lea.vmem %s675_s7, 64  ;;  %p1373_p12 = scmp.ne.s32.totalorder %s1367_s6, 0 }
  0x6a   : > { %805 = vmatpush1.msk.msra.mxu0 %vm382_vm0, %v1073_v5  ;;  %820 = vmatpush1.msk.msra.mxu1 %vm382_vm0, %v1073_v5  ;;  %v345_v12 = vrot.slane %v244_v8, %v344_v4  ;;  %v353_v13 = vrot.slane %v245_v9, %v344_v4  ;;  %v341_v14 = vrot.slane %v244_v8, %v340_v3  ;;  %p994_p3 = scmp.ne.s32.totalorder %s675_s7, %s993_s17  ;;  %s1075_s22 = smov [#allocation8]  }
  0x6b   : > { %v349_v15 = vrot.slane %v245_v9, %v340_v3  ;;  %v301_v16 = vrot.slane %v244_v8, %v300_v7  ;;  %v309_v17 = vrot.slane %v245_v9, %v300_v7  ;;  %v297_v18 = vrot.slane %v244_v8, %v296_v6  ;;  %s997_s16 = sshll.u32 %s1075_s22, 4  ;;  %s998_s16 = int_to_ptr.vmem [resolvable:$false] %s997_s16 }
  0x6c   : > { %v305_v19 = vrot.slane %v245_v9, %v296_v6  ;;  %v361_v20 = vrot.slane %v345_v12, %v340_v3  ;;  %v369_v21 = vrot.slane %v353_v13, %v340_v3  ;;  %v357_v22 = vrot.slane %v341_v14, %v340_v3  ;;  %p995_p10 = pnand %p994_p3, %p1373_p12  ;;  %s999_s28 = scalar_lea.vmem %s998_s16, 128 }
  0x6d   : > { %v365_v23 = vrot.slane %v349_v15, %v340_v3  ;;  %v317_v24 = vrot.slane %v301_v16, %v296_v6  ;;  %v325_v25 = vrot.slane %v309_v17, %v296_v6  ;;  %v313_v26 = vrot.slane %v297_v18, %v296_v6  ;;  %p1000_p13 = scmp.lt.s32.totalorder %s675_s7, %s998_s16  ;;  %p1001_p0 = scmp.lt.s32.totalorder %s999_s28, %s993_s17 }
  0x6e   : > { %v321_v27 = vrot.slane %v305_v19, %v296_v6  ;;  %vm371_vm1 = vcmp.eq.s32.totalorder %v1259_v2, %v361_v20  ;;  %vm373_vm2 = vcmp.eq.s32.totalorder %v1259_v2, %v369_v21  ;;  %vm370_vm3 = vcmp.eq.s32.totalorder %v1259_v2, %v357_v22  ;;  %p996_p2 = pneg %p995_p10 }
  0x6f   : > { %vm372_vm4 = vcmp.eq.s32.totalorder %v1259_v2, %v365_v23  ;;  %806 = vmatprep.subr.msk.mxu0 %vm371_vm1, %v1073_v5  ;;  %821 = vmatprep.subr.msk.mxu1 %vm373_vm2, %v1073_v5  ;;  %vm327_vm5 = vcmp.eq.s32.totalorder %v1259_v2, %v317_v24  ;;  %vm329_vm6 = vcmp.eq.s32.totalorder %v1259_v2, %v325_v25  ;;  %v1074_v15 = vmov 1966171168   ;;  %p1002_p5 = por %p1001_p0, %p1000_p13 }
  0x70   : > { %vm326_vm7 = vcmp.eq.s32.totalorder %v1259_v2, %v313_v26  ;;  %807 = vmatpush1.msk.msra.mxu0 %vm370_vm3, %v1073_v5  ;;  %822 = vmatpush1.msk.msra.mxu1 %vm372_vm4, %v1073_v5  ;;  %vm328_vm8 = vcmp.eq.s32.totalorder %v1259_v2, %v321_v27  ;;  %v257_v30 = vrot.slane %v244_v8, %v256_v11  ;;  %v632_v16 = vunpack.c.l.s4 %v1074_v15 }
  0x71   : > { %v265_v31 = vrot.slane %v245_v9, %v256_v11  ;;  %808 = vmatprep.subr.msk.mxu0 %vm327_vm5, %v1073_v5  ;;  %823 = vmatprep.subr.msk.mxu1 %vm329_vm6, %v1073_v5  ;;  %v253_v32 = vrot.slane %v244_v8, %v252_v10  ;;  %v261_v33 = vrot.slane %v245_v9, %v252_v10  ;;  %p1003_p9 = pnand %p1002_p5, %p996_p2 }
  0x72   : > { %809 = vmatpush1.msk.msra.mxu0 %vm326_vm7, %v1073_v5  ;;  %824 = vmatpush1.msk.msra.mxu1 %vm328_vm8, %v1073_v5  ;;  %v273_v35 = vrot.slane %v257_v30, %v252_v10  ;;  %v394_v41 = vcombine.high %v247_v37, %v247_v37  ;;  %v633_v27 = vunpack.c.0.s8 %v632_v16 }
  0x73   : > { %v281_v36 = vrot.slane %v265_v31, %v252_v10  ;;  %v269_v38 = vrot.slane %v253_v32, %v252_v10  ;;  %v277_v39 = vrot.slane %v261_v33, %v252_v10 }
  0x74   : > { %vm283_vm10 = vcmp.eq.s32.totalorder %v1259_v2, %v273_v35  ;;  %v636_v35 = vsub.s32 %v633_v27, %v1259_v2 }
  0x75   : > { %vm285_vm11 = vcmp.eq.s32.totalorder %v1259_v2, %v281_v36  ;;  %810 = vmatprep.subr.msk.mxu0 %vm283_vm10, %v1073_v5  ;;  %vm282_vm12 = vcmp.eq.s32.totalorder %v1259_v2, %v269_v38  ;;  %vm284_vm13 = vcmp.eq.s32.totalorder %v1259_v2, %v277_v39 }
  0x76   : > { %825 = vmatprep.subr.msk.mxu1 %vm285_vm11, %v1073_v5  ;;  %811 = vmatpush1.msk.msra.mxu0 %vm282_vm12, %v1073_v5 }
  0x77   : > { %826 = vmatpush1.msk.msra.mxu1 %vm284_vm13, %v1073_v5  ;;  %812 = vmatprep.subr.msk.mxu0 %vm397_vm9, %v393_v40 }
  0x78   : > { %827 = vmatprep.subr.msk.mxu1 %vm397_vm9, %v394_v41  ;;  %813 = vmatpush1.msk.msra.mxu0 %vm397_vm9, %v246_v34 }
  0x79   : > { %828 = vmatpush1.msk.msra.mxu1 %vm397_vm9, %v247_v37  ;;  %814 = vmatprep.subr.msk.mxu0 %vm397_vm9, %v387_v42 }
  0x7a   : > { %829 = vmatprep.subr.msk.mxu1 %vm397_vm9, %v388_v43  ;;  %815 = vmatpush1.msk.msra.mxu0 %vm397_vm9, %v242_v28 }
  0x7b   : > { %830 = vmatpush1.msk.msra.mxu1 %vm397_vm9, %v243_v29  ;;  %816 = vmatmul.mubr.msk.f32.vlgmr.msra.gmra.mxu0 %vm409_vm14, %v406_v44 }
  0x7c   : > { %831 = vmatmul.mubr.msk.f32.vlgmr.msra.gmra.mxu1 %vm409_vm14, %v406_v44  ;;  %489 = vmatprep.mubr.f32.mxu0 %v1072_v1 }
  0x7d   : > { %572 = vmatprep.mubr.f32.mxu1 %v1072_v1 }
  0x7f   : > { %817 = vmatmul.mubr.msk.f32.gmra.mxu0 %vm409_vm14, %v407_v45 }
  0x80   : > { %832 = vmatmul.mubr.msk.f32.gmra.mxu1 %vm409_vm14, %v407_v45  ;;  %495 = vmatprep.mubr.f32.mxu0 %v1072_v1 }
  0x81   : > { %578 = vmatprep.mubr.f32.mxu1 %v1072_v1 }
  0x83   : > { %818 = vmatmul.mubr.msk.f32.gmra.mxu0 %vm409_vm14, %v408_v46 }
  0x84   : > { %833 = vmatmul.mubr.msk.f32.gmra.mxu1 %vm409_vm14, %v408_v46 }
 0x13b   : > { %v485_v47 = vpop.f32.mrf.mxu0 }
 0x13c   : > { %v568_v48 = vpop.f32.mrf.mxu1  ;;  %v585_v51 = vmul.f32 %v485_v47, %v485_v47 }
 0x13d   : > { %v487_v49 = vpop.f32.mrf.mxu0  ;;  %v587_v52 = vmul.f32 %v568_v48, %v568_v48 }
 0x13e   : > { %v570_v50 = vpop.f32.mrf.mxu1  ;;  %v586_v55 = vmul.f32 %v487_v49, %v487_v49 }
 0x13f   : > { %v491_v53 = vpop.f32.mrf.mxu0  ;;  %v588_v56 = vmul.f32 %v570_v50, %v570_v50 }
 0x140   : > { %v574_v54 = vpop.f32.mrf.mxu1  ;;  %v589_v57 = vsub.f32 %v585_v51, %v491_v53 }
 0x141   : > { %v591_v58 = vsub.f32 %v587_v52, %v574_v54  ;;  %v493_v59 = vpop.f32.mrf.mxu0 }
 0x142   : > { %v576_v60 = vpop.f32.mrf.mxu1  ;;  %v593_v61 = vrot.slane %v589_v57, 4  ;;  %v590_v63 = vsub.f32 %v586_v55, %v493_v59 }
 0x143   : > { %v605_v62 = vrot.slane %v591_v58, 4  ;;  %v592_v1 = vsub.f32 %v588_v56, %v576_v60  ;;  %v497_v25 = vpop.f32.mrf.mxu0 }
 0x144   : > { %v594_v3 = vadd.f32 %v593_v61, %v589_v57  ;;  %v599_v5 = vrot.slane %v590_v63, 4  ;;  %v580_v26 = vpop.f32.mrf.mxu1 }
 0x145   : > { %v606_v4 = vadd.f32 %v605_v62, %v591_v58  ;;  %v611_v6 = vrot.slane %v592_v1, 4  ;;  %v499_v34 = vpop.f32.mrf.mxu0 }
 0x146   : > { %v595_v7 = vrot.slane %v594_v3, 2  ;;  %v600_v9 = vadd.f32 %v599_v5, %v590_v63  ;;  %v582_v36 = vpop.f32.mrf.mxu1 }
 0x147   : > { %v607_v8 = vrot.slane %v606_v4, 2  ;;  %v612_v10 = vadd.f32 %v611_v6, %v592_v1 }
 0x148   : > { %v596_v11 = vadd.f32 %v595_v7, %v594_v3  ;;  %v601_v13 = vrot.slane %v600_v9, 2 }
 0x149   : > { %v608_v12 = vadd.f32 %v607_v8, %v606_v4  ;;  %v613_v14 = vrot.slane %v612_v10, 2 }
 0x14a   : > { %v602_v17 = vadd.f32 %v601_v13, %v600_v9  ;;  %v597_v19 = vrot.slane %v596_v11, 1 }
 0x14b   : > { %v614_v18 = vadd.f32 %v613_v14, %v612_v10  ;;  %v609_v20 = vrot.slane %v608_v12, 1 }
 0x14c   : > { %v598_v21 = vadd.f32 %v597_v19, %v596_v11  ;;  %v603_v23 = vrot.slane %v602_v17, 1 }
 0x14d   : > { %v610_v22 = vadd.f32 %v609_v20, %v608_v12  ;;  %v615_v24 = vrot.slane %v614_v18, 1 }
 0x14e   : > { %v617_v28 = vmul.f32 0.5, %v598_v21  ;;  %v604_v30 = vadd.f32 %v603_v23, %v602_v17 }
 0x14f   : > { %v619_v29 = vmul.f32 0.5, %v610_v22  ;;  %v616_v31 = vadd.f32 %v615_v24, %v614_v18 }
 0x150   : > { %v618_v32 = vmul.f32 0.5, %v604_v30  ;;  %v621_v37 = vadd.f32 %v617_v28, %v497_v25 }
 0x151   : > { %v620_v33 = vmul.f32 0.5, %v616_v31  ;;  %v623_v38 = vadd.f32 %v619_v29, %v580_v26 }
 0x152   : > { %v622_v39 = vadd.f32 %v618_v32, %v499_v34 }
 0x153   : > { %v624_v40 = vadd.f32 %v620_v33, %v582_v36 }
 0x154   : > { %v629_v41 = vcombine.low %v621_v37, %v622_v39 }
 0x155   : > { %v630_v42 = vcombine.low %v623_v38, %v624_v40 }
 0x156   : > { %v637_v43 = vrot.slane %v629_v41, %v636_v35 }
 0x157   : > { %v644_v44 = vrot.slane %v630_v42, %v636_v35 }
 0x159   : > { %v645_v45 = vcombine.low %v637_v43, %v644_v44 }
 0x15b   : > { %v652_v46 = vrot.slane %v645_v45, %v636_v35 }
 0x15d   : > { %658 = vst.msk [vmem:[%s238_s10] sm:$0xf] %vm656_vm15, %v652_v46 }
 0x15e   : > { %1006 = shalt.err (!%p1003_p9)
}
 0x15f   : > { %s1007_s30 = scalar_lea.hbm %s672_s26, 64  ;;  %s1011_s21 = scalar_lea.hbm %s1357_s3, 128 }
 0x160   : > { %p1008_p1 = scmp.ne.s32.totalorder %s672_s26, %s1007_s30  ;;  %p1012_p7 = scmp.lt.s32.totalorder %s672_s26, %s1357_s3 }
 0x161   : > { %p1013_p11 = scmp.lt.s32.totalorder %s1011_s21, %s1007_s30 }
 0x162   : > { %p1009_p4 = pnand %p1008_p1, %p1373_p12 }
 0x163   : > { %p1014_p8 = por %p1013_p11, %p1012_p7 }
 0x164   : > { %p1010_p6 = pneg %p1009_p4 }
 0x166   : > { %p1015_p3 = pnand %p1014_p8, %p1010_p6 }
 0x168   : > { %1018 = shalt.err (!%p1015_p3)
}
 0x169   : > { %850 = dma.vmem_to_hbm [thread:$0]  (%p1373_p12), %s675_s7, 64, %s672_s26, %s660_s9  }
 0x16a PF: > { %s686_s27 = sand.u32 1, %s1053_s12   ;;  %p1374_p10 = scmp.ne.s32.totalorder %s1363_s19, 0 }
 0x16b   : > { %p1375_p2 = scmp.ge.s32.totalorder %s1065_s15, 2  ;;  %s687_s18 = scalar_lea.sflag [#allocation4], %s686_s27 }
 0x16d   : > { %p864_p13 = pnand %p1375_p2, %p1374_p10 }
 0x16f   : > { %p865_p0 = pneg %p864_p13 }
 0x171   : > { %1048 = dma.done.wait (%p865_p0), %s687_s18, 64  }
 0x172   : > { %1050 = vsyncadd (%p865_p0), %s687_s18, 4294967232  ;;  %p19_p5 = scmp.ge.s32.totalorder %s1150_s24, 4   ;;  %s1376_s12 = smov %s1057_s13 }
 0x173   : > { %s1377_s13 = smov %s1061_s14  ;;  %s1378_s14 = smov %s1167_s5 }
 0x174   : > { %s1379_s15 = smov %s1150_s24  ;;  %21 = sbr.rel (!%p19_p5) target bundleno = 7 (0x7), region = 94 }
 0x179   :  { %692 = vsyncpa [#allocation3], 1 }
 0x17a   :  { %694 = vsyncpa [#allocation3 + $0x1], 1 }
 0x17b   :  { %695 = vsyncpa [#allocation6], 1 }
 0x17c   :  { %697 = vsyncpa [#allocation6 + $0x1], 1 }
 0x17d   :  { %698 = vsyncpa [#allocation4], 1 }
 0x17e   :  { %700 = vsyncpa [#allocation4 + $0x1], 1 }

</bundles_post_ra>
